<compile_context>
chip_gen: v5e
topology: v5e:2x2
jax: 0.10.0
libtpu: 0.0.40
codegen_flags: <defaults>
</compile_context>

<pallas_src>
import jax
import jax.numpy as jnp
from jax.experimental import pallas as pl
from jax.experimental.pallas import tpu as pltpu

_NEG_SLOPE = 0.2      # GATConv default negative_slope
_MASK_VALUE = -1e30   # large negative sentinel baked into non-edge scores


def _gat_dense_kernel(score_ref, s_dst_ref, s_src_ref, h_ref, bias_ref, o_ref):
    """Fused single-head GAT row tile over a dense (masked) score matrix.

    score_ref : (TN, N)     bf16  a_edge.(W_edge e_ij); non-edges = -1e30
    s_dst_ref : (TN, 1)     f32   a_dst . h_i  (destination nodes, this tile)
    s_src_ref : (1, N)      f32   a_src . h_j  (all source nodes)
    h_ref     : (N, C_pad)  bf16  W_lin x      (all source nodes)
    bias_ref  : (1, C_pad)  f32   output bias (zero-padded)
    o_ref     : (TN, C_pad)       output row tile
    """
    f32 = jnp.float32
    # Attention logits (elementwise work stays f32 — portable to v5e VPU/EUP).
    logits = score_ref[...].astype(f32) + s_dst_ref[...] + s_src_ref[...]   # (TN, N)
    logits = jnp.where(logits > 0, logits, _NEG_SLOPE * logits)             # LeakyReLU

    # Softmax over incoming edges (columns = source nodes); sentinel entries
    # stay hugely negative through LeakyReLU and underflow to exactly 0.
    m = jnp.max(logits, axis=-1, keepdims=True)
    p = jnp.exp(logits - m)                                                 # (TN, N)
    denom = jnp.sum(p, axis=-1, keepdims=True)                              # (TN, 1)

    # Weighted aggregation on the MXU at bf16 rate, f32 accumulation; the
    # softmax reciprocal is folded in afterwards (EUP, approx).
    agg = jnp.dot(p.astype(jnp.bfloat16), h_ref[...],
                  preferred_element_type=f32)                               # (TN, C_pad)
    out = agg * pl.reciprocal(denom, approx=True) + bias_ref[...]
    o_ref[...] = out.astype(o_ref.dtype)                                    # lane-dense store


def _pick_block_rows(n_dst, n_src, c_pad, out_bytes=4, target=256,
                     vmem_budget=24 << 20):
    """Largest multiple-of-16 row tile <= target whose double-buffered streams
    plus resident tensors fit the VMEM budget (never falls back to full N)."""
    resident = n_src * c_pad * 2 + n_src * 4 + c_pad * 4        # h(bf16) + s_src + bias
    cap = max(16, ((n_dst + 15) // 16) * 16)
    start = min(max(16, (target // 16) * 16), cap)
    for tn in range(start, 15, -16):
        streamed = 2 * (tn * n_src * 2        # edge scores (bf16), 2 buffers
                        + tn * 4              # s_dst (f32)
                        + tn * c_pad * out_bytes)  # output tile
        if resident + streamed <= vmem_budget:
            return tn
    return 16


def _add_self_loops_mean(edge_index, edge_attr, num_nodes):
    """GATConv default: add self-loops with edge_attr fill_value='mean'."""
    src, dst = edge_index[0], edge_index[1]
    e = src.shape[0]
    deg = jax.ops.segment_sum(jnp.ones((e,), jnp.float32), dst, num_segments=num_nodes)
    attr_sum = jax.ops.segment_sum(edge_attr, dst, num_segments=num_nodes)
    loop_attr = attr_sum / jnp.maximum(deg, 1.0)[:, None]
    node_ids = jnp.arange(num_nodes, dtype=src.dtype)
    src_full = jnp.concatenate([src, node_ids])
    dst_full = jnp.concatenate([dst, node_ids])
    attr_full = jnp.concatenate([edge_attr, loop_attr], axis=0)
    return src_full, dst_full, attr_full


def attention_block_gat(x, edge_index, edge_attr, w_lin, a_src, a_dst,
                        w_edge, a_edge, bias, *, block_rows=256):
    """Forward of Attention_block (type='Gat', H=1) as a fused Pallas kernel."""
    n, _ = x.shape
    c = w_lin.shape[1]
    c_pad = ((c + 127) // 128) * 128          # lane-dense output width

    # --- host-side (plain JAX) precompute: done once, not per row tile -------
    h = x.astype(jnp.float32) @ w_lin.astype(jnp.float32)                 # (N, C)
    s_src = (h @ a_src.astype(jnp.float32)).reshape(1, n)                 # (1, N)
    s_dst = (h @ a_dst.astype(jnp.float32)).reshape(n, 1)                 # (N, 1)
    h_pad = jnp.zeros((n, c_pad), jnp.bfloat16).at[:, :c].set(h.astype(jnp.bfloat16))
    bias_row = jnp.zeros((1, c_pad), jnp.float32).at[:, :c].set(bias.astype(jnp.float32))

    # Self-loops (fill_value='mean') + dense per-edge scores with the adjacency
    # mask pre-baked as a large negative sentinel (no separate mask stream).
    # TODO(synk): edge-list gather/scatter stays in plain JAX; a fully sparse
    # Pallas GAT would need manual DMA gathers driven by scalar prefetch.
    src_full, dst_full, attr_full = _add_self_loops_mean(edge_index, edge_attr, n)
    edge_score_vec = (attr_full @ (w_edge.astype(jnp.float32)
                                   @ a_edge.astype(jnp.float32)))         # (E + N,)
    edge_score = jnp.full((n, n), _MASK_VALUE, jnp.float32)
    edge_score = edge_score.at[dst_full, src_full].set(edge_score_vec)

    # --- tiling --------------------------------------------------------------
    tn = _pick_block_rows(n, n, c_pad, out_bytes=x.dtype.itemsize,
                          target=block_rows)
    n_pad = pl.cdiv(n, tn) * tn
    if n_pad != n:                            # pad destination rows (zeros are
        edge_score = jnp.pad(edge_score, ((0, n_pad - n), (0, 0)))  # finite ->
        s_dst = jnp.pad(s_dst, ((0, n_pad - n), (0, 0)))            # no NaNs)
    edge_score = edge_score.astype(jnp.bfloat16)                    # halve HBM stream

    grid = (n_pad // tn,)
    # NOTE: h / s_src / bias are grid-invariant (index_map constant), so their
    # blocks are fetched once; pipeline_mode=pl.Buffered(1) could additionally
    # drop their second buffer to reclaim VMEM on v7x (64 MiB) if needed.
    out = pl.pallas_call(
        _gat_dense_kernel,
        out_shape=jax.ShapeDtypeStruct((n_pad, c_pad), x.dtype),
        grid=grid,
        in_specs=[
            pl.BlockSpec((tn, n), lambda i: (i, 0)),       # edge scores (masked)
            pl.BlockSpec((tn, 1), lambda i: (i, 0)),       # s_dst row tile
            pl.BlockSpec((1, n), lambda i: (0, 0)),        # s_src (all sources)
            pl.BlockSpec((n, c_pad), lambda i: (0, 0)),    # h (all sources)
            pl.BlockSpec((1, c_pad), lambda i: (0, 0)),    # bias
        ],
        out_specs=pl.BlockSpec((tn, c_pad), lambda i: (i, 0)),
        compiler_params=pltpu.CompilerParams(
            dimension_semantics=("parallel",),
            vmem_limit_bytes=32 * 1024 * 1024),
    )(edge_score, s_dst, s_src, h_pad, bias_row)

    return out[:n, :c]


def gat_reference(x, src, dst, edge_attr, w_lin, a_src, a_dst, w_edge, a_edge,
                  bias, num_nodes):
    """Pure-JAX sparse (segment-softmax) GATConv reference, eval mode, H=1."""
    h = x @ w_lin                                   # (N, C)
    s_src = h @ a_src                               # (N,)
    s_dst = h @ a_dst                               # (N,)
    s_edge = edge_attr @ (w_edge @ a_edge)          # (E,)
    logit = s_src[src] + s_dst[dst] + s_edge
    logit = jnp.where(logit > 0, logit, _NEG_SLOPE * logit)
    lmax = jax.ops.segment_max(logit, dst, num_segments=num_nodes)
    p = jnp.exp(logit - lmax[dst])
    denom = jax.ops.segment_sum(p, dst, num_segments=num_nodes)
    alpha = p / denom[dst]
    out = jax.ops.segment_sum(alpha[:, None] * h[src], dst, num_segments=num_nodes)
    return out + bias[None, :]


if __name__ == "__main__":
    # Module defaults: H=1, d_output=64, edge_dim=64, type='Gat'; small graph.
    N, d, H, d_output, edge_dim = 64, 32, 1, 64, 64
    C = d_output // H
    # TODO(synk): multi-head (H>1) would stack per-head attention vectors and
    # concat head outputs; the demo uses the module default H=1.

    key = jax.random.PRNGKey(0)
    ks = jax.random.split(key, 8)
    x = jax.random.normal(ks[0], (N, d), dtype=jnp.float32)

    # Deterministic simple graph: edges i -> (i + off) % N, off in {1, 3, 7, 11}.
    offsets = jnp.array([1, 3, 7, 11], dtype=jnp.int32)
    src = jnp.repeat(jnp.arange(N, dtype=jnp.int32), offsets.shape[0])
    dst = (src + jnp.tile(offsets, N)) % N
    edge_index = jnp.stack([src, dst])              # (2, E), E = 256
    E = src.shape[0]
    edge_attr = jax.random.normal(ks[1], (E, edge_dim), dtype=jnp.float32)

    scale = 0.1
    w_lin = jax.random.normal(ks[2], (d, C), dtype=jnp.float32) * scale
    w_edge = jax.random.normal(ks[3], (edge_dim, C), dtype=jnp.float32) * scale
    a_src = jax.random.normal(ks[4], (C,), dtype=jnp.float32) * scale
    a_dst = jax.random.normal(ks[5], (C,), dtype=jnp.float32) * scale
    a_edge = jax.random.normal(ks[6], (C,), dtype=jnp.float32) * scale
    bias = jax.random.normal(ks[7], (C,), dtype=jnp.float32) * scale

    # block_rows=16 forces a multi-tile grid (4 row tiles) at this small N.
    out = attention_block_gat(x, edge_index, edge_attr, w_lin, a_src, a_dst,
                              w_edge, a_edge, bias, block_rows=16)
    out = jax.block_until_ready(out)

    src_f, dst_f, attr_f = _add_self_loops_mean(edge_index, edge_attr, N)
    ref = gat_reference(x, src_f, dst_f, attr_f, w_lin, a_src, a_dst,
                        w_edge, a_edge, bias, N)

    assert out.shape == (N, d_output)
    assert jnp.allclose(out, ref, atol=2e-2, rtol=2e-2), "mismatch vs reference"
    print("KERNEL_OK")
</pallas_src>

<mosaic_0001>
module attributes {stable_mosaic.version = 11 : i64} {
  func.func @_gat_dense_kernel(%arg0: i32, %arg1: memref<16x64xbf16, #tpu.memory_space<vmem>>, %arg2: memref<16x1xf32, #tpu.memory_space<vmem>>, %arg3: memref<1x64xf32, #tpu.memory_space<vmem>>, %arg4: memref<64x128xbf16, #tpu.memory_space<vmem>>, %arg5: memref<1x128xf32, #tpu.memory_space<vmem>>, %arg6: memref<16x128xf32, #tpu.memory_space<vmem>>) attributes {dimension_semantics = [#tpu.dimension_semantics<parallel>], iteration_bounds = array<i64: 4>, scalar_prefetch = 0 : i64, scratch_operands = 0 : i64, tpu.core_type = #tpu.core_type<tc>, window_params = [{transform_indices = @transform_0, window_bounds = array<i64: 16, 64>}, {transform_indices = @transform_1, window_bounds = array<i64: 16, 1>}, {pipeline_mode = #tpu.pipeline_mode<synchronous>, transform_indices = @transform_2, window_bounds = array<i64: 1, 64>}, {pipeline_mode = #tpu.pipeline_mode<synchronous>, transform_indices = @transform_3, window_bounds = array<i64: 64, 128>}, {pipeline_mode = #tpu.pipeline_mode<synchronous>, transform_indices = @transform_4, window_bounds = array<i64: 1, 128>}, {transform_indices = @transform_5, window_bounds = array<i64: 16, 128>}]} {
    %c0 = arith.constant 0 : index
    %c0_0 = arith.constant 0 : index
    %0 = vector.load %arg1[%c0, %c0_0] : memref<16x64xbf16, #tpu.memory_space<vmem>>, vector<16x64xbf16>
    %1 = arith.extf %0 : vector<16x64xbf16> to vector<16x64xf32>
    %c0_1 = arith.constant 0 : index
    %c0_2 = arith.constant 0 : index
    %2 = vector.load %arg2[%c0_1, %c0_2] : memref<16x1xf32, #tpu.memory_space<vmem>>, vector<16x1xf32>
    %3 = vector.broadcast %2 : vector<16x1xf32> to vector<16x64xf32>
    %4 = arith.addf %1, %3 : vector<16x64xf32>
    %c0_3 = arith.constant 0 : index
    %c0_4 = arith.constant 0 : index
    %5 = vector.load %arg3[%c0_3, %c0_4] : memref<1x64xf32, #tpu.memory_space<vmem>>, vector<1x64xf32>
    %6 = vector.broadcast %5 : vector<1x64xf32> to vector<16x64xf32>
    %7 = arith.addf %4, %6 : vector<16x64xf32>
    %cst = arith.constant 0.000000e+00 : f32
    %8 = vector.broadcast %cst : f32 to vector<16x64xf32>
    %9 = arith.cmpf ogt, %7, %8 : vector<16x64xf32>
    %cst_5 = arith.constant 2.000000e-01 : f32
    %10 = vector.broadcast %cst_5 : f32 to vector<16x64xf32>
    %11 = arith.mulf %10, %7 : vector<16x64xf32>
    %12 = arith.select %9, %7, %11 : vector<16x64xi1>, vector<16x64xf32>
    %cst_6 = arith.constant dense<0xFF800000> : vector<16xf32>
    %13 = vector.multi_reduction <maximumf>, %12, %cst_6 [1] : vector<16x64xf32> to vector<16xf32>
    %14 = vector.shape_cast %13 : vector<16xf32> to vector<16x1xf32>
    %15 = vector.broadcast %14 : vector<16x1xf32> to vector<16x64xf32>
    %16 = arith.subf %12, %15 : vector<16x64xf32>
    %17 = math.exp %16 : vector<16x64xf32>
    %cst_7 = arith.constant dense<0.000000e+00> : vector<16xf32>
    %18 = vector.multi_reduction <add>, %17, %cst_7 [1] : vector<16x64xf32> to vector<16xf32>
    %19 = vector.shape_cast %18 : vector<16xf32> to vector<16x1xf32>
    %20 = arith.truncf %17 : vector<16x64xf32> to vector<16x64xbf16>
    %c0_8 = arith.constant 0 : index
    %c0_9 = arith.constant 0 : index
    %21 = vector.load %arg4[%c0_8, %c0_9] : memref<64x128xbf16, #tpu.memory_space<vmem>>, vector<64x128xbf16>
    %cst_10 = arith.constant dense<0.000000e+00> : vector<16x128xf32>
    %22 = tpu.matmul %20, %21, %cst_10 {dimension_numbers = #tpu.dot_dimension_numbers<[1], [0], [0], [1], [0, 0, 1, 1], [], []>} : vector<16x64xbf16>, vector<64x128xbf16>, vector<16x128xf32> -> vector<16x128xf32>
    %23 = tpu.reciprocal %19 {approx = true} : vector<16x1xf32> -> vector<16x1xf32>
    %24 = vector.broadcast %23 : vector<16x1xf32> to vector<16x128xf32>
    %25 = arith.mulf %22, %24 : vector<16x128xf32>
    %c0_11 = arith.constant 0 : index
    %c0_12 = arith.constant 0 : index
    %26 = vector.load %arg5[%c0_11, %c0_12] : memref<1x128xf32, #tpu.memory_space<vmem>>, vector<1x128xf32>
    %27 = vector.broadcast %26 : vector<1x128xf32> to vector<16x128xf32>
    %28 = arith.addf %25, %27 : vector<16x128xf32>
    %c0_13 = arith.constant 0 : index
    %c0_14 = arith.constant 0 : index
    %29 = vector.load %arg6[%c0_13, %c0_14] : memref<16x128xf32, #tpu.memory_space<vmem>>, vector<16x128xf32>
    tpu.vector_store %arg6[%c0_13, %c0_14], %28 {strides = array<i32>} : memref<16x128xf32, #tpu.memory_space<vmem>>, vector<16x128xf32>,
    return
  }
  func.func @transform_0(%arg0: i32) -> (i32, i32) {
    %c0_i32 = arith.constant 0 : i32
    %c0_i32_0 = arith.constant 0 : i32
    return %arg0, %c0_i32 : i32, i32
  }
  func.func @transform_1(%arg0: i32) -> (i32, i32) {
    %c0_i32 = arith.constant 0 : i32
    %c0_i32_0 = arith.constant 0 : i32
    return %arg0, %c0_i32 : i32, i32
  }
  func.func @transform_2(%arg0: i32) -> (i32, i32) {
    %c0_i32 = arith.constant 0 : i32
    %c0_i32_0 = arith.constant 0 : i32
    %c0_i32_1 = arith.constant 0 : i32
    return %c0_i32, %c0_i32_0 : i32, i32
  }
  func.func @transform_3(%arg0: i32) -> (i32, i32) {
    %c0_i32 = arith.constant 0 : i32
    %c0_i32_0 = arith.constant 0 : i32
    %c0_i32_1 = arith.constant 0 : i32
    return %c0_i32, %c0_i32_0 : i32, i32
  }
  func.func @transform_4(%arg0: i32) -> (i32, i32) {
    %c0_i32 = arith.constant 0 : i32
    %c0_i32_0 = arith.constant 0 : i32
    %c0_i32_1 = arith.constant 0 : i32
    return %c0_i32, %c0_i32_0 : i32, i32
  }
  func.func @transform_5(%arg0: i32) -> (i32, i32) {
    %c0_i32 = arith.constant 0 : i32
    %c0_i32_0 = arith.constant 0 : i32
    return %arg0, %c0_i32 : i32, i32
  }
}

</mosaic_0001>

<bundles_post_ra>
// kernel: tpu_custom_call.1
= control target key start
LH: loop header
LB: loop body
LE: loop exit
PB: predicated region body
PF: predicated region fallthrough
CT: control target
= control target key end

     0   :  { %10 = vsyncpa [#allocation3], 0  ;;  %s750_s0 = inlined_call_operand.vmem [shape: bf16[64,64], index: 0, kind: input, shape index: {}]   ;;  %s751_s1 = inlined_call_operand.vmem [shape: f32[64,1], index: 1, kind: input, shape index: {}]   ;;  %s752_s2 = inlined_call_operand.vmem [shape: f32[1,64], index: 2, kind: input, shape index: {}]   ;;  %s753_s3 = inlined_call_operand.vmem [shape: bf16[64,128], index: 3, kind: input, shape index: {}]   ;;  %s754_s4 = inlined_call_operand.vmem [shape: f32[1,128], index: 4, kind: input, shape index: {}]   ;;  %s755_s5 = inlined_call_operand.hbm [shape: f32[64,128], index: 5, kind: output, shape index: {}]  }
   0x1   :  { %12 = vsyncpa [#allocation3 + $0x1], 0  ;;  %s640_s18 = smov 0   ;;  %s642_s19 = smov 0  }
   0x2   :  { %s644_s20 = smov 0   ;;  %s646_s21 = smov 0  }
   0x3 LB: > { %s661_s22 = sadd.s32 4294967295, %s605_s21   ;;  %s450_s23 = sadd.s32 4294967294, %s605_s21   ;;  %s605_s21 = sphi %s646_s21, %s761_s21   ;;  %s601_s20 = sphi %s644_s20, %s760_s20   ;;  %s597_s19 = sphi %s642_s19, %s759_s19   ;;  %s593_s18 = sphi %s640_s18, %s758_s18  }
   0x4   : > { %s665_s24 = sadd.s32 1, %s605_s21   ;;  %s140_s25 = sadd.s32 1, %s601_s20 }
   0x5   : > { %s137_s26 = ssub.s32 %s605_s21, %s665_s24  ;;  %p150_p0 = scmp.ne.s32.totalorder %s601_s20, %s597_s19 }
   0x6   : > { %p138_p1 = scmp.eq.s32.totalorder %s137_s26, 0  ;;  %p151_p2 = scmp.eq.s32.totalorder %s661_s22, 3 }
   0x7   : > { %p156_p3 = scmp.ne.s32.totalorder %s597_s19, %s593_s18  ;;  %p157_p4 = scmp.eq.s32.totalorder %s450_s23, 3 }
   0x8   : > { %s676_s27 = scalar_select %p138_p1, %s601_s20, %s140_s25  }
   0x9   : > { %p678_p5 = por %p151_p2, %p150_p0  ;;  %p682_p6 = por %p157_p4, %p156_p3 }
   0xa   : > { %p453_p7 = scmp.ge.s32.totalorder %s605_s21, 1  ;;  %p202_p8 = scmp.lt.s32.totalorder %s605_s21, 5 }
   0xc   : > { %p203_p9 = pnand %p453_p7, %p202_p8 }
   0xd   : > { %s455_s30 = sshll.u32 (!%p203_p9), %s661_s22, 1  ;;  %s232_s8 = sand.u32 (!%p203_p9), 1, %s597_s19  }
   0xe   : > { %206 = sbr.rel (%p203_p9) target bundleno = 425 (0x1a9), region = 40  ;;  %p236_p10 = scmp.lt.s32.totalorder (!%p203_p9), %s455_s30, 7 }
   0xf   : > { %s485_s12 = sshll.u32 (!%p203_p9), %s661_s22, 4  ;;  %s361_s25 = scalar_lea.sflag (!%p203_p9), [#allocation3], %s232_s8 }
  0x10   : > { %s372_s15 = scalar_lea.hbm (!%p203_p9), %s755_s5, %s485_s12  ;;  %s563_s7 = scalar_lea.hbm (!%p203_p9), %s755_s5, 64 }
  0x11   : > { %s375_s23 = sshll.u32 (!%p203_p9), %s372_s15, 4  ;;  %s376_s23 = int_to_ptr.hbm [resolvable:$true] %s375_s23 }
  0x12   : > { %s557_s22 = sshra.s32 (!%p203_p9), %s376_s23, 4  ;;  %s558_s22 = int_to_ptr.hbm [resolvable:$true] %s557_s22 }
  0x13   : > { %v607_v0 = vmov 0   ;;  %s763_s30 = smov (!%p236_p10, %s455_s30), 7  ;;  %v533_v5 = vld [vmem:[%s752_s2] ss:$0 sm:$0xff]  ;;  %vm279_vm1 = vcmask 523264   ;;  %v484_v19 = vld [vmem:[%s753_s3 + $0x18] sm:$0xff]  ;;  %p564_p0 = scmp.lt.s32.totalorder %s558_s22, %s755_s5 }
  0x14   : > { %532 = vset.pattern.permute.xlu0 %v607_v0  ;;  %s458_s6 = sshll.u32 %s763_s30, 3  ;;  %s456_s10 = sshll.u32 %s763_s30, 2  ;;  %338 = vmatpush.bf16.msra.mxu0 %v484_v19  ;;  %v483_v20 = vld [vmem:[%s753_s3 + $0x10] sm:$0xff]  ;;  %v482_v21 = vld [vmem:[%s753_s3 + $0x8] sm:$0xff]  ;;  %v481_v22 = vld [vmem:[%s753_s3] sm:$0xff] }
  0x15   : > { %s245_s9 = scalar_lea.vmem %s751_s1, %s458_s6  ;;  %s239_s13 = scalar_lea.vmem %s750_s0, %s456_s10  ;;  %v534_v36 = vld [vmem:[%s754_s4] ss:$0 sm:$0xff] }
  0x16   : > { %v253_v1 = vld [vmem:[%s245_s9] sm:$0xff]  ;;  %v254_v2 = vld [vmem:[%s245_s9 + $0x8] sm:$0xff]  ;;  %s454_s9 = sshll.u32 %s232_s8, 4  ;;  %s559_s26 = scalar_lea.hbm %s558_s22, 16 }
  0x17   : > { %257 = vperm.xlu0 %532, %v253_v1   ;;  %v487_v3 = vld [vmem:[%s239_s13] sm:$0xff]   ;;  %s234_s16 = scalar_lea.vmem [#allocation2], %s454_s9  ;;  %p560_p11 = scmp.ne.s32.totalorder %s558_s22, %s559_s26 }
  0x18   : > { %v488_v4 = vunpack.c.l.bf16 %v487_v3  ;;  %v489_v9 = vunpack.c.h.bf16 %v487_v3  ;;  %339 = vmatpush.bf16.msra.mxu0 %v483_v20  ;;  %s373_s17 = sshll.u32 %s234_s16, 4  ;;  %p565_p1 = scmp.lt.s32.totalorder %s563_s7, %s559_s26  ;;  %s374_s17 = int_to_ptr.vmem [resolvable:$true] %s373_s17 }
  0x19   : > { %p561_p12 = pnand %p560_p11, %p678_p5 }
  0x1a   : > { %p566_p2 = por %p565_p1, %p564_p0 }
  0x1b   : > { %p562_p13 = pneg %p561_p12 }
  0x1c   : > { %340 = vmatpush.bf16.msra.mxu0 %v482_v21 }
  0x1d   : > { %p567_p3 = pnand %p566_p2, %p562_p13 }
  0x1f   : > { %262 = vperm.xlu0 %532, %v254_v2  }
  0x20   : > { %341 = vmatpush.bf16.msra.mxu0 %v481_v22 }
  0x89   : > { %v258_v6 = vpop.permute.xlu0 %257 }
  0x8a   : > { %v265_v7 = vadd.f32 %v488_v4, %v258_v6 }
  0x8c   : > { %v271_v8 = vadd.f32 %v533_v5, %v265_v7 }
  0x8e   : > { %vm273_vm0 = vcmp.gt.f32.partialorder %v271_v8, 0.0  ;;  %v275_v10 = vmul.f32 0.2, %v271_v8 }
  0x90   : > { %v277_v11 = vsel %vm273_vm0, %v271_v8, %v275_v10 }
  0x91   : > { %v263_v12 = vpop.permute.xlu0 %262  ;;  %v280_v13 = vsel %vm279_vm1, %v277_v11, -inf }
  0x92   : > { %v266_v14 = vadd.f32 %v489_v9, %v263_v12  ;;  %281 = vmax.xlane.f32.xlu1 %v280_v13 }
  0x94   : > { %v272_v15 = vadd.f32 %v533_v5, %v266_v14 }
  0x96   : > { %vm274_vm2 = vcmp.gt.f32.partialorder %v272_v15, 0.0  ;;  %v276_v16 = vmul.f32 0.2, %v272_v15 }
  0x98   : > { %v278_v17 = vsel %vm274_vm2, %v272_v15, %v276_v16 }
  0x99   : > { %v283_v18 = vsel %vm279_vm1, %v278_v17, -inf }
  0x9a   : > { %284 = vmax.xlane.f32.xlu1 %v283_v18 }
 0x105   : > { %v282_v23 = vpop.xlane.xlu1 %281 }
 0x106   : > { %v286_v24 = vsub.f32 %v277_v11, %v282_v23 }
 0x108   : > { %v288_v25 = vmul.f32 1.442695, %v286_v24 }
 0x10a   : > { %535 = vpow2.f32 %v288_v25 }
 0x10d   : > { %v285_v26 = vpop.xlane.xlu1 %284 }
 0x10e   : > { %v287_v27 = vsub.f32 %v278_v17, %v285_v26 }
 0x110   : > { %v536_v28 = vpop.eup %535  ;;  %v290_v29 = vmul.f32 1.442695, %v287_v27 }
 0x111   : > { %v292_v30 = vsel %vm279_vm1, %v536_v28, 0.0 }
 0x112   : > { %537 = vpow2.f32 %v290_v29  ;;  %293 = vadd.xlane.f32.xlu2 %v292_v30 }
 0x118   : > { %v538_v31 = vpop.eup %537 }
 0x119   : > { %v295_v32 = vsel %vm279_vm1, %v538_v31, 0.0  ;;  %v298_v33 = vpack.c.bf16 %v538_v31, %v536_v28 }
 0x11a   : > { %296 = vadd.xlane.f32.xlu2 %v295_v32 }
 0x11b   : > { %475 = vmatmul.msk.bf16.vlgmr.msra.gmra.mxu0 %vm279_vm1, %v298_v33 }
 0x185   : > { %v294_v34 = vpop.xlane.xlu2 %293 }
 0x186   : > { %539 = vrcp.f32 %v294_v34 }
 0x18c   : > { %v540_v37 = vpop.eup %539 }
 0x18d   : > { %v297_v35 = vpop.xlane.xlu2 %296 }
 0x18e   : > { %541 = vrcp.f32 %v297_v35 }
 0x194   : > { %v542_v41 = vpop.eup %541 }
 0x198   : > { %v343_v38 = vpop.f32.mrf.mxu0 }
 0x199   : > { %v350_v39 = vmul.f32 %v540_v37, %v343_v38 }
 0x19b   : > { %v356_v40 = vadd.f32 %v534_v36, %v350_v39 }
 0x19d   : > { %358 = vst [vmem:[%s234_s16] sm:$0xff] %v356_v40 }
 0x1a0   : > { %v345_v42 = vpop.f32.mrf.mxu0 }
 0x1a1   : > { %v351_v43 = vmul.f32 %v542_v41, %v345_v42 }
 0x1a3   : > { %v357_v44 = vadd.f32 %v534_v36, %v351_v43 }
 0x1a5   : > { %359 = vst [vmem:[%s234_s16 + $0x8] sm:$0xff] %v357_v44 }
 0x1a6   : > { %570 = shalt.err (!%p567_p3)
}
 0x1a7   : > { %s608_s8 = smov 128   ;;  %s609_s11 = smov 8  }
 0x1a8   : > { %490 = dma.vmem_to_hbm [thread:$0]  (%p678_p5), %s374_s17, 256, %s376_s23, %s361_s25, %s608_s8, %s608_s8, %s609_s11  }
 0x1a9 PF: > { %p496_p4 = scmp.ge.s32.totalorder %s605_s21, 2  ;;  %s390_s12 = sand.u32 1, %s593_s18  }
 0x1aa   : > { %s391_s13 = scalar_lea.sflag [#allocation3], %s390_s12 }
 0x1ab   : > { %p493_p7 = pnand %p496_p4, %p682_p6 }
 0x1ad   : > { %p494_p8 = pneg %p493_p7 }
 0x1af   : > { %588 = dma.done.wait (%p494_p8), %s391_s13, 256  }
 0x1b0   : > { %590 = vsyncadd (%p494_p8), %s391_s13, 4294967040  ;;  %p15_p9 = scmp.ge.s32.totalorder %s665_s24, 6   ;;  %s758_s18 = smov %s597_s19 }
 0x1b1   : > { %s759_s19 = smov %s601_s20  ;;  %s760_s20 = smov %s676_s27 }
 0x1b2   : > { %s761_s21 = smov %s665_s24  ;;  %17 = sbr.rel (!%p15_p9) target bundleno = 3 (0x3), region = 78 }
 0x1b7   :  { %397 = vsyncpa [#allocation3], 1 }
 0x1b8   :  { %399 = vsyncpa [#allocation3 + $0x1], 1 }

</bundles_post_ra>
